<compile_context>
chip_gen: v7x
topology: tpu7x:2x2x1
jax: 0.10.0
libtpu: 0.0.40
codegen_flags: <defaults>
</compile_context>

<pallas_src>
import jax
import jax.numpy as jnp
from jax.experimental import pallas as pl
from jax.experimental.pallas import tpu as pltpu


def classifier_head_kernel(cls_ref, w_ref, b_ref, out_ref):
    """cls_ref: [TB, H] VMEM, w_ref: [H, C] VMEM, b_ref: [C] f32 SMEM, out: [TB, C]."""
    logits = jnp.dot(cls_ref[...], w_ref[...],
                     preferred_element_type=jnp.float32)            # [TB, C]
    # Bias add from SMEM scalars (C == 2): select per output column on the VPU
    # instead of DMA-ing a padded [1, C] VMEM tile.
    col = jax.lax.broadcasted_iota(jnp.int32, logits.shape, dimension=1)
    bias = jnp.where(col == 0, b_ref[0], b_ref[1])
    out_ref[...] = (logits + bias).astype(out_ref.dtype)


def roberta_hate_speech_classifier_forward(last_hidden_state, wc, bc, *,
                                           block_b=None):
    """CLS-pool + dropout(eval) + Linear(H, C) fused into one Pallas kernel.

    last_hidden_state: [B, T, H] f32 (encoder output)
    wc: [C, H] f32 (PyTorch nn.Linear weight layout), bc: [C] f32
    returns logits [B, C] f32
    """
    B, T, H = last_hidden_state.shape
    C = wc.shape[0]
    assert C == 2, "kernel's SMEM bias path is written for num_classes == 2"

    # Wrapper-side layout plumbing (no FLOPs):
    #   CLS pooling == slice of token 0 -> lane-dense [B, H] kernel input.
    #   Transpose classifier weight once to [H, C].
    cls = last_hidden_state[:, 0, :]
    wt = jnp.transpose(wc)

    # Batch tile: full B for small batches; multiple-of-8 tiles when gridding.
    if block_b is None:
        block_b = B if B <= 128 else 128
    grid = (pl.cdiv(B, block_b),)

    return pl.pallas_call(
        classifier_head_kernel,
        out_shape=jax.ShapeDtypeStruct((B, C), jnp.float32),
        grid=grid,
        in_specs=[
            pl.BlockSpec((block_b, H), lambda i: (i, 0)),
            pl.BlockSpec((H, C), lambda i: (0, 0)),
            pl.BlockSpec(memory_space=pltpu.MemorySpace.SMEM),
        ],
        out_specs=pl.BlockSpec((block_b, C), lambda i: (i, 0)),
        compiler_params=pltpu.CompilerParams(
            dimension_semantics=("parallel",)),
    )(cls, wt, bc)


def standin_encoder(input_ids, attention_mask, emb_table):
    # TODO(synk): stand-in for the pretrained RoBERTa encoder (no Pallas
    #             equivalent); deterministic embedding lookup masked by
    #             attention_mask, only to provide last_hidden_state.
    hidden = emb_table[input_ids]                                   # [B, T, H]
    return hidden * attention_mask[..., None].astype(hidden.dtype)


def reference_forward(last_hidden_state, wc, bc):
    pooled = last_hidden_state[:, 0, :]       # CLS token
    # dropout is identity in eval mode
    return pooled @ wc.T + bc                 # [B, C]


if __name__ == "__main__":
    # roberta-base hidden size, small batch / sequence / vocab
    B, T, H, C, V = 8, 16, 768, 2, 128
    key = jax.random.PRNGKey(0)
    k_ids, k_emb, k_wc, k_bc = jax.random.split(key, 4)

    # deterministic example inputs (module signature: input_ids, attention_mask)
    input_ids = jax.random.randint(k_ids, (B, T), 0, V, dtype=jnp.int32)
    attention_mask = jnp.ones((B, T), dtype=jnp.int32)

    # deterministic synthetic parameters
    emb_table = jax.random.normal(k_emb, (V, H), dtype=jnp.float32) * 0.02
    wc = jax.random.normal(k_wc, (C, H), dtype=jnp.float32) * 0.05  # nn.Linear(768, 2).weight
    bc = jax.random.normal(k_bc, (C,), dtype=jnp.float32) * 0.05    # nn.Linear(768, 2).bias

    last_hidden_state = standin_encoder(input_ids, attention_mask, emb_table)

    logits = roberta_hate_speech_classifier_forward(last_hidden_state, wc, bc)
    logits = jax.block_until_ready(logits)

    ref = reference_forward(last_hidden_state, wc, bc)
    assert logits.shape == (B, C)
    assert jnp.allclose(logits, ref, atol=1e-4, rtol=1e-4), (logits, ref)

    print("KERNEL_OK")
</pallas_src>

<mosaic_0001>
module attributes {stable_mosaic.version = 11 : i64} {
  func.func @classifier_head_kernel(%arg0: i32, %arg1: memref<8x768xf32, #tpu.memory_space<vmem>>, %arg2: memref<768x2xf32, #tpu.memory_space<vmem>>, %arg3: memref<2xf32, #tpu.memory_space<smem>>, %arg4: memref<8x2xf32, #tpu.memory_space<vmem>>) attributes {dimension_semantics = [#tpu.dimension_semantics<parallel>], iteration_bounds = array<i64: 1>, scalar_prefetch = 0 : i64, scratch_operands = 0 : i64, tpu.core_type = #tpu.core_type<tc>, window_params = [{transform_indices = @transform_0, window_bounds = array<i64: 8, 768>}, {pipeline_mode = #tpu.pipeline_mode<synchronous>, transform_indices = @transform_1, window_bounds = array<i64: 768, 2>}, {transform_indices = @transform_2, window_bounds = array<i64: 2>}, {transform_indices = @transform_3, window_bounds = array<i64: 8, 2>}]} {
    %c0 = arith.constant 0 : index
    %c0_0 = arith.constant 0 : index
    %0 = vector.load %arg1[%c0, %c0_0] : memref<8x768xf32, #tpu.memory_space<vmem>>, vector<8x768xf32>
    %c0_1 = arith.constant 0 : index
    %c0_2 = arith.constant 0 : index
    %1 = vector.load %arg2[%c0_1, %c0_2] : memref<768x2xf32, #tpu.memory_space<vmem>>, vector<768x2xf32>
    %cst = arith.constant dense<0.000000e+00> : vector<8x2xf32>
    %2 = tpu.matmul %0, %1, %cst {dimension_numbers = #tpu.dot_dimension_numbers<[1], [0], [0], [1], [0, 0, 1, 1], [], []>} : vector<8x768xf32>, vector<768x2xf32>, vector<8x2xf32> -> vector<8x2xf32>
    %3 = tpu.iota {dimensions = array<i32: 1>} : vector<8x2xi32>
    %c0_i32 = arith.constant 0 : i32
    %4 = vector.broadcast %c0_i32 : i32 to vector<8x2xi32>
    %5 = arith.cmpi eq, %3, %4 : vector<8x2xi32>
    %c0_3 = arith.constant 0 : index
    %6 = memref.load %arg3[%c0_3] : memref<2xf32, #tpu.memory_space<smem>>
    %c1 = arith.constant 1 : index
    %7 = memref.load %arg3[%c1] : memref<2xf32, #tpu.memory_space<smem>>
    %8 = vector.broadcast %6 : f32 to vector<8x2xf32>
    %9 = vector.broadcast %7 : f32 to vector<8x2xf32>
    %10 = arith.select %5, %8, %9 : vector<8x2xi1>, vector<8x2xf32>
    %11 = arith.addf %2, %10 : vector<8x2xf32>
    %c0_4 = arith.constant 0 : index
    %c0_5 = arith.constant 0 : index
    %12 = vector.load %arg4[%c0_4, %c0_5] : memref<8x2xf32, #tpu.memory_space<vmem>>, vector<8x2xf32>
    tpu.vector_store %arg4[%c0_4, %c0_5], %11 {strides = array<i32>} : memref<8x2xf32, #tpu.memory_space<vmem>>, vector<8x2xf32>,
    return
  }
  func.func @transform_0(%arg0: i32) -> (i32, i32) {
    %c0_i32 = arith.constant 0 : i32
    %c0_i32_0 = arith.constant 0 : i32
    return %arg0, %c0_i32 : i32, i32
  }
  func.func @transform_1(%arg0: i32) -> (i32, i32) {
    %c0_i32 = arith.constant 0 : i32
    %c0_i32_0 = arith.constant 0 : i32
    %c0_i32_1 = arith.constant 0 : i32
    return %c0_i32, %c0_i32_0 : i32, i32
  }
  func.func @transform_2(%arg0: i32) -> i32 {
    %c0_i32 = arith.constant 0 : i32
    %c0_i32_0 = arith.constant 0 : i32
    return %c0_i32 : i32
  }
  func.func @transform_3(%arg0: i32) -> (i32, i32) {
    %c0_i32 = arith.constant 0 : i32
    %c0_i32_0 = arith.constant 0 : i32
    return %arg0, %c0_i32 : i32, i32
  }
}

</mosaic_0001>

<bundles_post_ra>
// kernel: tpu_custom_call.1
= control target key start
LH: loop header
LB: loop body
LE: loop exit
PB: predicated region body
PF: predicated region fallthrough
CT: control target
= control target key end

     0   :  { %8 = vsyncpa [#allocation3], 0  ;;  %s904_s0 = inlined_call_operand.vmem [shape: f32[8,768], index: 0, kind: input, shape index: {}]   ;;  %s905_s1 = inlined_call_operand.vmem [shape: f32[768,2], index: 1, kind: input, shape index: {}]   ;;  %s906_s2 = inlined_call_operand.vmem [shape: f32[2], index: 2, kind: input, shape index: {}]   ;;  %s907_s3 = inlined_call_operand.vmem [shape: f32[8,2], index: 3, kind: output, shape index: {}]  }
   0x1   :  { %s19_s14 = sshll.u32 %s906_s2, 4  ;;  %s20_s14 = int_to_ptr.vmem [resolvable:$true] %s19_s14 }
   0x2   :  { %s557_s15 = scalar_lea.vmem %s20_s14, 16  ;;  %p562_p1 = scmp.lt.s32.totalorder %s20_s14, %s20_s14 }
   0x3   :  { %p558_p0 = scmp.ne.s32.totalorder %s20_s14, %s557_s15  ;;  %p563_p2 = scmp.lt.s32.totalorder %s557_s15, %s557_s15 }
   0x5   :  { %p564_p3 = por %p563_p2, %p562_p1 }
   0x7   :  { %p565_p4 = pnand %p564_p3, %p558_p0 }
   0x9   :  { %568 = shalt.err (!%p565_p4)
}
   0xa   :  { %s571_s16 = smov [#allocation2]  }
   0xb   :  { %22 = dma.vmem_to_smem %s20_s14, 16, %s571_s16, [#allocation3]  }
   0xc   :  { %569 = dma.done.wait [#allocation3], 16  }
   0xd   :  { %570 = vsyncadd [#allocation3], 4294967280 }
   0xe   :  { %26 = sfence }
   0xf   :  { %v49_v0 = vld [vmem:[%s905_s1 + $0x80] sm:$0xff]  ;;  %v50_v1 = vld [vmem:[%s905_s1 + $0x88] sm:$0xff]  ;;  %v51_v11 = vld [vmem:[%s905_s1 + $0x90] sm:$0xff]  ;;  %s132_s24 = sld [smem:[#allocation2]]  ;;  %s354_s25 = sld [smem:[#allocation2 + $0x1]]  ;;  %vm347_vm1 = vcmask 15360  }
  0x10   :  { %v33_v2 = vld [vmem:[%s905_s1] sm:$0xff]  ;;  %v460_v3 = vpack.c.bf16 %v50_v1, %v49_v0  ;;  %v34_v4 = vld [vmem:[%s905_s1 + $0x8] sm:$0xff]  ;;  %v52_v13 = vld [vmem:[%s905_s1 + $0x98] sm:$0xff] }
  0x11   :  { %v81_v5 = vld [vmem:[%s905_s1 + $0x180] sm:$0xff]  ;;  %v82_v6 = vld [vmem:[%s905_s1 + $0x188] sm:$0xff]  ;;  %v462_v7 = vpack.c.bf16 %v34_v4, %v33_v2  ;;  %v35_v14 = vld [vmem:[%s905_s1 + $0x10] sm:$0xff]  ;;  %v464_v16 = vpack.c.bf16 %v52_v13, %v51_v11 }
  0x12   :  { %v492_v8 = vpack.c.bf16 %v82_v6, %v81_v5  ;;  %v65_v9 = vld [vmem:[%s905_s1 + $0x100] sm:$0xff]  ;;  %v66_v10 = vld [vmem:[%s905_s1 + $0x108] sm:$0xff]  ;;  %461 = vmatprep.subr.bf16.mxu0 %v460_v3  ;;  %v36_v15 = vld [vmem:[%s905_s1 + $0x18] sm:$0xff] }
  0x13   :  { %v494_v12 = vpack.c.bf16 %v66_v10, %v65_v9  ;;  %463 = vmatpush3.bf16.msra.mxu0 %v462_v7  ;;  %v466_v17 = vpack.c.bf16 %v36_v15, %v35_v14  ;;  %v83_v18 = vld [vmem:[%s905_s1 + $0x190] sm:$0xff]  ;;  %v84_v19 = vld [vmem:[%s905_s1 + $0x198] sm:$0xff]  ;;  %v53_v23 = vld [vmem:[%s905_s1 + $0xa0] sm:$0xff] }
  0x14   :  { %493 = vmatprep.subr.bf16.mxu1 %v492_v8  ;;  %v67_v20 = vld [vmem:[%s905_s1 + $0x110] sm:$0xff]  ;;  %v496_v21 = vpack.c.bf16 %v84_v19, %v83_v18  ;;  %v68_v22 = vld [vmem:[%s905_s1 + $0x118] sm:$0xff]  ;;  %v54_v24 = vld [vmem:[%s905_s1 + $0xa8] sm:$0xff]  ;;  %465 = vmatprep.subr.bf16.mxu0 %v464_v16 }
  0x15   :  { %495 = vmatpush3.bf16.msra.mxu1 %v494_v12  ;;  %v498_v25 = vpack.c.bf16 %v68_v22, %v67_v20  ;;  %v468_v26 = vpack.c.bf16 %v54_v24, %v53_v23  ;;  %v37_v27 = vld [vmem:[%s905_s1 + $0x20] sm:$0xff]  ;;  %v38_v28 = vld [vmem:[%s905_s1 + $0x28] sm:$0xff]  ;;  %v55_v35 = vld [vmem:[%s905_s1 + $0xb0] sm:$0xff] }
  0x16   :  { %v85_v29 = vld [vmem:[%s905_s1 + $0x1a0] sm:$0xff]  ;;  %497 = vmatprep.subr.bf16.mxu1 %v496_v21  ;;  %v86_v30 = vld [vmem:[%s905_s1 + $0x1a8] sm:$0xff]  ;;  %v470_v33 = vpack.c.bf16 %v38_v28, %v37_v27  ;;  %v56_v36 = vld [vmem:[%s905_s1 + $0xb8] sm:$0xff] }
  0x17   :  { %v69_v31 = vld [vmem:[%s905_s1 + $0x120] sm:$0xff]  ;;  %v70_v32 = vld [vmem:[%s905_s1 + $0x128] sm:$0xff]  ;;  %467 = vmatpush3.bf16.msra.mxu0 %v466_v17  ;;  %v500_v34 = vpack.c.bf16 %v86_v30, %v85_v29  ;;  %v39_v37 = vld [vmem:[%s905_s1 + $0x30] sm:$0xff]  ;;  %v472_v39 = vpack.c.bf16 %v56_v36, %v55_v35 }
  0x18   :  { %469 = vmatprep.subr.bf16.mxu0 %v468_v26  ;;  %v502_v38 = vpack.c.bf16 %v70_v32, %v69_v31  ;;  %v40_v40 = vld [vmem:[%s905_s1 + $0x38] sm:$0xff]  ;;  %v87_v41 = vld [vmem:[%s905_s1 + $0x1b0] sm:$0xff]  ;;  %v57_v46 = vld [vmem:[%s905_s1 + $0xc0] sm:$0xff] }
  0x19   :  { %499 = vmatpush3.bf16.msra.mxu1 %v498_v25  ;;  %v88_v42 = vld [vmem:[%s905_s1 + $0x1b8] sm:$0xff]  ;;  %v71_v44 = vld [vmem:[%s905_s1 + $0x130] sm:$0xff]  ;;  %v58_v47 = vld [vmem:[%s905_s1 + $0xc8] sm:$0xff]  ;;  %v474_v48 = vpack.c.bf16 %v40_v40, %v39_v37 }
  0x1a   :  { %501 = vmatprep.subr.bf16.mxu1 %v500_v34  ;;  %v504_v43 = vpack.c.bf16 %v88_v42, %v87_v41  ;;  %v72_v45 = vld [vmem:[%s905_s1 + $0x138] sm:$0xff]  ;;  %v89_v49 = vld [vmem:[%s905_s1 + $0x1c0] sm:$0xff]  ;;  %v90_v50 = vld [vmem:[%s905_s1 + $0x1c8] sm:$0xff]  ;;  %v476_v52 = vpack.c.bf16 %v58_v47, %v57_v46 }
  0x1b   :  { %471 = vmatpush3.bf16.msra.mxu0 %v470_v33  ;;  %v506_v51 = vpack.c.bf16 %v72_v45, %v71_v44  ;;  %v41_v53 = vld [vmem:[%s905_s1 + $0x40] sm:$0xff]  ;;  %v42_v54 = vld [vmem:[%s905_s1 + $0x48] sm:$0xff]  ;;  %v508_v56 = vpack.c.bf16 %v90_v50, %v89_v49  ;;  %v59_v58 = vld [vmem:[%s905_s1 + $0xd0] sm:$0xff] }
  0x1c   :  { %473 = vmatprep.subr.bf16.mxu0 %v472_v39  ;;  %v73_v55 = vld [vmem:[%s905_s1 + $0x140] sm:$0xff]  ;;  %v74_v57 = vld [vmem:[%s905_s1 + $0x148] sm:$0xff]  ;;  %v60_v59 = vld [vmem:[%s905_s1 + $0xd8] sm:$0xff]  ;;  %v478_v62 = vpack.c.bf16 %v42_v54, %v41_v53 }
  0x1d   :  { %503 = vmatpush3.bf16.msra.mxu1 %v502_v38  ;;  %v91_v60 = vld [vmem:[%s905_s1 + $0x1d0] sm:$0xff]  ;;  %v92_v61 = vld [vmem:[%s905_s1 + $0x1d8] sm:$0xff]  ;;  %v510_v63 = vpack.c.bf16 %v74_v57, %v73_v55  ;;  %v480_v0 = vpack.c.bf16 %v60_v59, %v59_v58  ;;  %v61_v6 = vld [vmem:[%s905_s1 + $0xe0] sm:$0xff] }
  0x1e   :  { %505 = vmatprep.subr.bf16.mxu1 %v504_v43  ;;  %v43_v1 = vld [vmem:[%s905_s1 + $0x50] sm:$0xff]  ;;  %v44_v2 = vld [vmem:[%s905_s1 + $0x58] sm:$0xff]  ;;  %v512_v4 = vpack.c.bf16 %v92_v61, %v91_v60  ;;  %v62_v7 = vld [vmem:[%s905_s1 + $0xe8] sm:$0xff] }
  0x1f   :  { %475 = vmatpush3.bf16.msra.mxu0 %v474_v48  ;;  %v75_v3 = vld [vmem:[%s905_s1 + $0x150] sm:$0xff]  ;;  %v76_v5 = vld [vmem:[%s905_s1 + $0x158] sm:$0xff]  ;;  %v93_v8 = vld [vmem:[%s905_s1 + $0x1e0] sm:$0xff]  ;;  %v482_v10 = vpack.c.bf16 %v44_v2, %v43_v1  ;;  %v484_v14 = vpack.c.bf16 %v62_v7, %v61_v6 }
  0x20   :  { %477 = vmatprep.subr.bf16.mxu0 %v476_v52  ;;  %v94_v9 = vld [vmem:[%s905_s1 + $0x1e8] sm:$0xff]  ;;  %v45_v11 = vld [vmem:[%s905_s1 + $0x60] sm:$0xff]  ;;  %v514_v13 = vpack.c.bf16 %v76_v5, %v75_v3  ;;  %v63_v19 = vld [vmem:[%s905_s1 + $0xf0] sm:$0xff] }
  0x21   :  { %507 = vmatpush3.bf16.msra.mxu1 %v506_v51  ;;  %v28_v12 = vld [vmem:[%s904_s0 + $0x8] sm:$0xff]  ;;  %v77_v16 = vld [vmem:[%s905_s1 + $0x160] sm:$0xff]  ;;  %v516_v18 = vpack.c.bf16 %v94_v9, %v93_v8  ;;  %v64_v20 = vld [vmem:[%s905_s1 + $0xf8] sm:$0xff] }
  0x22   :  { %509 = vmatprep.subr.bf16.mxu1 %v508_v56  ;;  %v46_v15 = vld [vmem:[%s905_s1 + $0x68] sm:$0xff]  ;;  %201 = vmatprep.mubr.f32.mxu0 %v28_v12  ;;  %v30_v21 = vld [vmem:[%s904_s0 + $0x18] sm:$0xff]  ;;  %v95_v22 = vld [vmem:[%s905_s1 + $0x1f0] sm:$0xff]  ;;  %v488_v26 = vpack.c.bf16 %v64_v20, %v63_v19 }
  0x23   :  { %479 = vmatpush3.bf16.msra.mxu0 %v478_v62  ;;  %v78_v17 = vld [vmem:[%s905_s1 + $0x168] sm:$0xff]  ;;  %v96_v23 = vld [vmem:[%s905_s1 + $0x1f8] sm:$0xff]  ;;  %271 = vmatprep.mubr.f32.mxu1 %v30_v21  ;;  %v486_v24 = vpack.c.bf16 %v46_v15, %v45_v11  ;;  %v47_v27 = vld [vmem:[%s905_s1 + $0x70] sm:$0xff] }
  0x24   :  { %481 = vmatprep.subr.bf16.mxu0 %v480_v0  ;;  %v518_v25 = vpack.c.bf16 %v78_v17, %v77_v16  ;;  %v48_v28 = vld [vmem:[%s905_s1 + $0x78] sm:$0xff]  ;;  %v79_v29 = vld [vmem:[%s905_s1 + $0x170] sm:$0xff]  ;;  %v520_v30 = vpack.c.bf16 %v96_v23, %v95_v22  ;;  %v113_v32 = vld [vmem:[%s905_s1 + $0x280] sm:$0xff]  ;;  %v129_v22 = vlaneseq }
  0x25   :  { %511 = vmatpush3.bf16.msra.mxu1 %v510_v63  ;;  %v80_v31 = vld [vmem:[%s905_s1 + $0x178] sm:$0xff]  ;;  %v114_v33 = vld [vmem:[%s905_s1 + $0x288] sm:$0xff]  ;;  %v490_v34 = vpack.c.bf16 %v48_v28, %v47_v27  ;;  %v97_v37 = vld [vmem:[%s905_s1 + $0x200] sm:$0xff] }
  0x26   :  { %513 = vmatprep.subr.bf16.mxu1 %v512_v4  ;;  %v522_v35 = vpack.c.bf16 %v80_v31, %v79_v29  ;;  %v524_v36 = vpack.c.bf16 %v114_v33, %v113_v32  ;;  %v98_v38 = vld [vmem:[%s905_s1 + $0x208] sm:$0xff]  ;;  %v115_v39 = vld [vmem:[%s905_s1 + $0x290] sm:$0xff]  ;;  %v116_v40 = vld [vmem:[%s905_s1 + $0x298] sm:$0xff]  ;;  %v130_v23 = vand.u32 127, %v129_v22 }
  0x27   :  { %483 = vmatpush3.bf16.msra.mxu0 %v482_v10  ;;  %v27_v41 = vld [vmem:[%s904_s0] sm:$0xff]  ;;  %v526_v42 = vpack.c.bf16 %v98_v38, %v97_v37  ;;  %v29_v43 = vld [vmem:[%s904_s0 + $0x10] sm:$0xff]  ;;  %v528_v44 = vpack.c.bf16 %v116_v40, %v115_v39  ;;  %v100_v46 = vld [vmem:[%s905_s1 + $0x218] sm:$0xff] }
  0x28   :  { %485 = vmatprep.subr.bf16.mxu0 %v484_v14  ;;  %v99_v45 = vld [vmem:[%s905_s1 + $0x210] sm:$0xff]  ;;  %v117_v47 = vld [vmem:[%s905_s1 + $0x2a0] sm:$0xff]  ;;  %v118_v48 = vld [vmem:[%s905_s1 + $0x2a8] sm:$0xff]  ;;  %vm131_vm0 = vcmp.eq.s32.totalorder %v130_v23, 0 }
  0x29   :  { %515 = vmatpush3.bf16.msra.mxu1 %v514_v13  ;;  %v32_v49 = vld [vmem:[%s904_s0 + $0x28] sm:$0xff]  ;;  %v530_v50 = vpack.c.bf16 %v100_v46, %v99_v45  ;;  %v532_v51 = vpack.c.bf16 %v118_v48, %v117_v47  ;;  %v101_v52 = vld [vmem:[%s905_s1 + $0x220] sm:$0xff]  ;;  %v119_v54 = vld [vmem:[%s905_s1 + $0x2b0] sm:$0xff] }
  0x2a   :  { %517 = vmatprep.subr.bf16.mxu1 %v516_v18  ;;  %v102_v53 = vld [vmem:[%s905_s1 + $0x228] sm:$0xff]  ;;  %v120_v55 = vld [vmem:[%s905_s1 + $0x2b8] sm:$0xff]  ;;  %v103_v58 = vld [vmem:[%s905_s1 + $0x230] sm:$0xff] }
  0x2b   :  { %487 = vmatpush3.bf16.msra.mxu0 %v486_v24  ;;  %v534_v56 = vpack.c.bf16 %v102_v53, %v101_v52  ;;  %v536_v57 = vpack.c.bf16 %v120_v55, %v119_v54  ;;  %v104_v59 = vld [vmem:[%s905_s1 + $0x238] sm:$0xff]  ;;  %v121_v60 = vld [vmem:[%s905_s1 + $0x2c0] sm:$0xff]  ;;  %v122_v61 = vld [vmem:[%s905_s1 + $0x2c8] sm:$0xff]  ;;  %v134_v24 = vstv %s132_s24 }
  0x2c   :  { %489 = vmatprep.subr.bf16.mxu0 %v488_v26  ;;  %v538_v62 = vpack.c.bf16 %v104_v59, %v103_v58  ;;  %v540_v63 = vpack.c.bf16 %v122_v61, %v121_v60  ;;  %v105_v0 = vld [vmem:[%s905_s1 + $0x240] sm:$0xff]  ;;  %v106_v1 = vld [vmem:[%s905_s1 + $0x248] sm:$0xff]  ;;  %v123_v2 = vld [vmem:[%s905_s1 + $0x2d0] sm:$0xff] }
  0x2d   :  { %519 = vmatpush3.bf16.msra.mxu1 %v518_v25  ;;  %v124_v3 = vld [vmem:[%s905_s1 + $0x2d8] sm:$0xff]  ;;  %v542_v4 = vpack.c.bf16 %v106_v1, %v105_v0  ;;  %v107_v6 = vld [vmem:[%s905_s1 + $0x250] sm:$0xff]  ;;  %v125_v8 = vld [vmem:[%s905_s1 + $0x2e0] sm:$0xff]  ;;  %v135_v25 = vstv %s354_s25 }
  0x2e   :  { %521 = vmatprep.subr.bf16.mxu1 %v520_v30  ;;  %v544_v5 = vpack.c.bf16 %v124_v3, %v123_v2  ;;  %v108_v7 = vld [vmem:[%s905_s1 + $0x258] sm:$0xff]  ;;  %v126_v9 = vld [vmem:[%s905_s1 + $0x2e8] sm:$0xff]  ;;  %v109_v12 = vld [vmem:[%s905_s1 + $0x260] sm:$0xff]  ;;  %v136_v27 = vsel %vm131_vm0, %v134_v24, %v135_v25 }
  0x2f   :  { %491 = vmatpush3.bf16.msra.mxu0 %v490_v34  ;;  %v546_v10 = vpack.c.bf16 %v108_v7, %v107_v6  ;;  %v548_v11 = vpack.c.bf16 %v126_v9, %v125_v8  ;;  %v110_v13 = vld [vmem:[%s905_s1 + $0x268] sm:$0xff]  ;;  %v127_v14 = vld [vmem:[%s905_s1 + $0x2f0] sm:$0xff]  ;;  %v128_v15 = vld [vmem:[%s905_s1 + $0x2f8] sm:$0xff] }
  0x30   :  { %525 = vmatprep.subr.bf16.mxu0 %v524_v36  ;;  %v550_v16 = vpack.c.bf16 %v110_v13, %v109_v12  ;;  %v552_v17 = vpack.c.bf16 %v128_v15, %v127_v14  ;;  %v111_v18 = vld [vmem:[%s905_s1 + $0x270] sm:$0xff]  ;;  %v112_v19 = vld [vmem:[%s905_s1 + $0x278] sm:$0xff]  ;;  %v31_v21 = vld [vmem:[%s904_s0 + $0x20] sm:$0xff] }
  0x31   :  { %523 = vmatpush3.bf16.msra.mxu1 %v522_v35  ;;  %v554_v20 = vpack.c.bf16 %v112_v19, %v111_v18 }
  0x32   :  { %202 = vmatmul.mubr.f32.vlgmr.msra.gmra.mrb[0].mxu0 %v27_v41 }
  0x33   :  { %527 = vmatpush3.bf16.msra.mxu0 %v526_v42  ;;  %341 = vmatprep.mubr.f32.mxu0 %v32_v49 }
  0x34   :  { %272 = vmatmul.mubr.f32.vlgmr.msra.gmra.mrb[0].mxu1 %v29_v43  ;;  %529 = vmatprep.subr.bf16.mxu0 %v528_v44 }
  0x37   :  { %531 = vmatpush3.bf16.msra.mxu0 %v530_v50 }
  0x38   :  { %533 = vmatprep.subr.bf16.mxu0 %v532_v51 }
  0x3b   :  { %535 = vmatpush3.bf16.msra.mxu0 %v534_v56 }
  0x3c   :  { %537 = vmatprep.subr.bf16.mxu0 %v536_v57 }
  0x3f   :  { %539 = vmatpush3.bf16.msra.mxu0 %v538_v62 }
  0x40   :  { %541 = vmatprep.subr.bf16.mxu0 %v540_v63 }
  0x43   :  { %543 = vmatpush3.bf16.msra.mxu0 %v542_v4 }
  0x44   :  { %545 = vmatprep.subr.bf16.mxu0 %v544_v5 }
  0x47   :  { %547 = vmatpush3.bf16.msra.mxu0 %v546_v10 }
  0x48   :  { %549 = vmatprep.subr.bf16.mxu0 %v548_v11 }
  0x4b   :  { %551 = vmatpush3.bf16.msra.mxu0 %v550_v16 }
  0x4c   :  { %553 = vmatprep.subr.bf16.mxu0 %v552_v17 }
  0x4f   :  { %555 = vmatpush3.bf16.msra.mxu0 %v554_v20 }
  0x52   :  { %342 = vmatmul.mubr.f32.vlgmr.msra.gmra.mrb[2].mxu0 %v31_v21 }
 0x105   :  { %v387_v26 = vpop.f32.mrb[0].mxu0 }
 0x106   :  { %v388_v28 = vpop.f32.mrb[1].mxu0 }
 0x107   :  { %v422_v29 = vpop.f32.mrb[0].mxu1  ;;  %v389_v30 = vadd.f32 %v388_v28, %v387_v26 }
 0x108   :  { %v423_v31 = vpop.f32.mrb[1].mxu1 }
 0x109   :  { %v424_v32 = vadd.f32 %v423_v31, %v422_v29  ;;  %v204_v33 = vadd.f32 %v389_v30, %v136_v27 }
 0x10b   :  { %v274_v34 = vadd.f32 %v424_v32, %v204_v33 }
 0x125   :  { %v457_v35 = vpop.f32.mrb[2].mxu0 }
 0x126   :  { %v458_v36 = vpop.f32.mrb[3].mxu0 }
 0x127   :  { %v459_v37 = vadd.f32 %v458_v36, %v457_v35 }
 0x129   :  { %v344_v38 = vadd.f32 %v459_v37, %v274_v34 }
 0x12b   :  { %348 = vst.msk [vmem:[%s907_s3] sm:$0xff] %vm347_vm1, %v344_v38 }
 0x12c   :  { %353 = vsyncpa [#allocation3], 1 }

</bundles_post_ra>
